<compile_context>
chip_gen: v6e
topology: v6e:2x2x1
jax: 0.10.0
libtpu: 0.0.40
codegen_flags: <defaults>
</compile_context>

<pallas_src>
import jax
import jax.numpy as jnp
from jax.experimental import pallas as pl
from jax.experimental.pallas import tpu as pltpu

M_TILE_MAX = 128     # LHS rows per output tile
TK_MAX = 512         # reduction (dim_model) tile, multiple of 128
TV_MAX = 1024        # vocab tile, multiple of 128 (lane-dense stores)


def _round_up(x, m):
    return ((x + m - 1) // m) * m


def _head_kernel(h_ref, w_ref, o_ref, acc_ref):
    # h_ref: (Mt, TK) bf16   w_ref: (TK, TV) bf16   o_ref: (Mt, TV) f32
    k = pl.program_id(2)

    @pl.when(k == 0)
    def _():
        acc_ref[...] = jnp.zeros_like(acc_ref)

    acc_ref[...] += jnp.dot(h_ref[...], w_ref[...],
                            preferred_element_type=jnp.float32)

    @pl.when(k == pl.num_programs(2) - 1)
    def _():
        o_ref[...] = acc_ref[...].astype(o_ref.dtype)


def _head_kernel_bias(h_ref, w_ref, b_ref, o_ref, acc_ref):
    # b_ref: (1, TV) f32 — bias is added once, in the finalize branch only.
    k = pl.program_id(2)

    @pl.when(k == 0)
    def _():
        acc_ref[...] = jnp.zeros_like(acc_ref)

    acc_ref[...] += jnp.dot(h_ref[...], w_ref[...],
                            preferred_element_type=jnp.float32)

    @pl.when(k == pl.num_programs(2) - 1)
    def _():
        o_ref[...] = (acc_ref[...] + b_ref[...]).astype(o_ref.dtype)


def transformer_head(hidden_states, weight, bias=None):
    """hidden_states: (B, S, D).  weight: (V, D) (PyTorch layout).
    bias: optional (V,).  Returns f32 logits (B, S, V)."""
    B, S, D = hidden_states.shape
    V, Dw = weight.shape
    assert D == Dw, (D, Dw)
    M = B * S

    # ---- tile / padding derivation -------------------------------------
    if M <= M_TILE_MAX:
        m_tile = _round_up(M, 8)
        m_pad = m_tile
    else:
        m_tile = M_TILE_MAX
        m_pad = _round_up(M, m_tile)

    if D <= TK_MAX:
        tk = D                       # full-extent K block (always legal)
        d_pad = D
    else:
        tk = TK_MAX
        d_pad = _round_up(D, tk)

    if V <= TV_MAX:
        tv = _round_up(V, 128)       # keep the output lane-dense
        v_pad = tv
    else:
        tv = TV_MAX
        v_pad = _round_up(V, tv)

    grid = (m_pad // m_tile, v_pad // tv, d_pad // tk)

    # ---- operand prep: bf16 streams, weight pre-transposed to (D, V) ----
    h2 = hidden_states.reshape(M, D).astype(jnp.bfloat16)
    wt = weight.astype(jnp.bfloat16).T                      # (D, V)
    if (m_pad, d_pad) != (M, D):
        h2 = jnp.pad(h2, ((0, m_pad - M), (0, d_pad - D)))
    if (d_pad, v_pad) != (D, V):
        wt = jnp.pad(wt, ((0, d_pad - D), (0, v_pad - V)))

    h_spec = pl.BlockSpec((m_tile, tk), lambda i, j, k: (i, k))
    n_weight_tiles = grid[0] * grid[1] * grid[2]
    if n_weight_tiles >= 3:
        w_spec = pl.BlockSpec((tk, tv), lambda i, j, k: (k, j),
                              pipeline_mode=pl.Buffered(3))
    else:
        w_spec = pl.BlockSpec((tk, tv), lambda i, j, k: (k, j))

    in_specs = [h_spec, w_spec]
    args = [h2, wt]
    if bias is not None:
        b2 = bias.astype(jnp.float32).reshape(1, V)
        if v_pad != V:
            b2 = jnp.pad(b2, ((0, 0), (0, v_pad - V)))
        in_specs.append(pl.BlockSpec((1, tv), lambda i, j, k: (0, j)))
        args.append(b2)
        kernel = _head_kernel_bias
    else:
        kernel = _head_kernel

    out = pl.pallas_call(
        kernel,
        out_shape=jax.ShapeDtypeStruct((m_pad, v_pad), jnp.float32),
        grid_spec=pltpu.PrefetchScalarGridSpec(
            num_scalar_prefetch=0,
            grid=grid,
            in_specs=in_specs,
            out_specs=pl.BlockSpec((m_tile, tv), lambda i, j, k: (i, j)),
            scratch_shapes=[pltpu.VMEM((m_tile, tv), jnp.float32)],
        ),
        compiler_params=pltpu.CompilerParams(
            dimension_semantics=("parallel", "parallel", "arbitrary"),
            vmem_limit_bytes=64 * 1024 * 1024,
        ),
    )(*args)

    return out[:M, :V].reshape(B, S, V)
    # TODO(synk): parallel_output=False would all-gather the vocab-sharded
    # logits across tensor-parallel ranks; single-device it is the identity.


if __name__ == "__main__":
    key = jax.random.PRNGKey(0)
    k_h, k_emb, k_w, k_b = jax.random.split(key, 4)

    B, S, D, V = 2, 8, 32, 128       # batch, seq, dim_model, vocab_size
    hidden = jax.random.normal(k_h, (B, S, D), jnp.float32)
    word_embeddings_weight = 0.02 * jax.random.normal(k_emb, (V, D), jnp.float32)
    own_weight = 0.02 * jax.random.normal(k_w, (V, D), jnp.float32)
    bias = 0.02 * jax.random.normal(k_b, (V,), jnp.float32)

    def reference(h, w, b):
        # Same bf16 rounding of the streamed operands, f32 accumulation.
        hf = h.astype(jnp.bfloat16).astype(jnp.float32)
        wf = w.astype(jnp.bfloat16).astype(jnp.float32)
        out = jnp.einsum("bsd,vd->bsv", hf, wf)
        if b is not None:
            out = out + b
        return out

    # Case 1: share_target_embeddings=True, bias=False (module defaults).
    out_shared = jax.block_until_ready(
        transformer_head(hidden, word_embeddings_weight, bias=None))
    ref_shared = reference(hidden, word_embeddings_weight, None)
    assert out_shared.shape == (B, S, V)
    assert jnp.allclose(out_shared, ref_shared, atol=2e-3, rtol=2e-3), (
        float(jnp.max(jnp.abs(out_shared - ref_shared))))

    # Case 2: share_target_embeddings=False, bias=True (own weight + bias).
    out_own = jax.block_until_ready(
        transformer_head(hidden, own_weight, bias=bias))
    ref_own = reference(hidden, own_weight, bias)
    assert jnp.allclose(out_own, ref_own, atol=2e-3, rtol=2e-3), (
        float(jnp.max(jnp.abs(out_own - ref_own))))

    print("KERNEL_OK")
</pallas_src>

<mosaic_0001>
module attributes {stable_mosaic.version = 11 : i64} {
  func.func @_head_kernel(%arg0: i32, %arg1: i32, %arg2: i32, %arg3: memref<16x32xbf16, #tpu.memory_space<vmem>>, %arg4: memref<32x128xbf16, #tpu.memory_space<vmem>>, %arg5: memref<16x128xf32, #tpu.memory_space<vmem>>, %arg6: memref<16x128xf32, #tpu.memory_space<vmem>>) attributes {dimension_semantics = [#tpu.dimension_semantics<parallel>, #tpu.dimension_semantics<parallel>, #tpu.dimension_semantics<arbitrary>], iteration_bounds = array<i64: 1, 1, 1>, scalar_prefetch = 0 : i64, scratch_operands = 1 : i64, tpu.core_type = #tpu.core_type<tc>, window_params = [{transform_indices = @transform_0, window_bounds = array<i64: 16, 32>}, {transform_indices = @transform_1, window_bounds = array<i64: 32, 128>}, {transform_indices = @transform_2, window_bounds = array<i64: 16, 128>}]} {
    %c0_i32 = arith.constant 0 : i32
    %0 = arith.cmpi eq, %arg2, %c0_i32 : i32
    %1 = arith.extui %0 : i1 to i32
    %c0_i32_0 = arith.constant 0 : i32
    %2 = arith.cmpi ne, %1, %c0_i32_0 : i32
    scf.if %2 {
      %cst_10 = arith.constant 0.000000e+00 : f32
      %12 = vector.broadcast %cst_10 : f32 to vector<16x128xf32>
      %c0_11 = arith.constant 0 : index
      %c0_12 = arith.constant 0 : index
      %13 = vector.load %arg6[%c0_11, %c0_12] : memref<16x128xf32, #tpu.memory_space<vmem>>, vector<16x128xf32>
      tpu.vector_store %arg6[%c0_11, %c0_12], %12 {strides = array<i32>} : memref<16x128xf32, #tpu.memory_space<vmem>>, vector<16x128xf32>,
    } else {
    }
    %c0 = arith.constant 0 : index
    %c0_1 = arith.constant 0 : index
    %3 = vector.load %arg6[%c0, %c0_1] : memref<16x128xf32, #tpu.memory_space<vmem>>, vector<16x128xf32>
    %c0_2 = arith.constant 0 : index
    %c0_3 = arith.constant 0 : index
    %4 = vector.load %arg3[%c0_2, %c0_3] : memref<16x32xbf16, #tpu.memory_space<vmem>>, vector<16x32xbf16>
    %c0_4 = arith.constant 0 : index
    %c0_5 = arith.constant 0 : index
    %5 = vector.load %arg4[%c0_4, %c0_5] : memref<32x128xbf16, #tpu.memory_space<vmem>>, vector<32x128xbf16>
    %cst = arith.constant dense<0.000000e+00> : vector<16x128xf32>
    %6 = tpu.matmul %4, %5, %cst {dimension_numbers = #tpu.dot_dimension_numbers<[1], [0], [0], [1], [0, 0, 1, 1], [], []>} : vector<16x32xbf16>, vector<32x128xbf16>, vector<16x128xf32> -> vector<16x128xf32>
    %7 = arith.addf %3, %6 : vector<16x128xf32>
    %c0_6 = arith.constant 0 : index
    %c0_7 = arith.constant 0 : index
    %8 = vector.load %arg6[%c0_6, %c0_7] : memref<16x128xf32, #tpu.memory_space<vmem>>, vector<16x128xf32>
    tpu.vector_store %arg6[%c0_6, %c0_7], %7 {strides = array<i32>} : memref<16x128xf32, #tpu.memory_space<vmem>>, vector<16x128xf32>,
    %c0_i32_8 = arith.constant 0 : i32
    %9 = arith.cmpi eq, %arg2, %c0_i32_8 : i32
    %10 = arith.extui %9 : i1 to i32
    %c0_i32_9 = arith.constant 0 : i32
    %11 = arith.cmpi ne, %10, %c0_i32_9 : i32
    scf.if %11 {
      %c0_10 = arith.constant 0 : index
      %c0_11 = arith.constant 0 : index
      %12 = vector.load %arg6[%c0_10, %c0_11] : memref<16x128xf32, #tpu.memory_space<vmem>>, vector<16x128xf32>
      %c0_12 = arith.constant 0 : index
      %c0_13 = arith.constant 0 : index
      %13 = vector.load %arg5[%c0_12, %c0_13] : memref<16x128xf32, #tpu.memory_space<vmem>>, vector<16x128xf32>
      tpu.vector_store %arg5[%c0_12, %c0_13], %12 {strides = array<i32>} : memref<16x128xf32, #tpu.memory_space<vmem>>, vector<16x128xf32>,
    } else {
    }
    return
  }
  func.func @transform_0(%arg0: i32, %arg1: i32, %arg2: i32) -> (i32, i32) {
    %c0_i32 = arith.constant 0 : i32
    return %arg0, %arg2 : i32, i32
  }
  func.func @transform_1(%arg0: i32, %arg1: i32, %arg2: i32) -> (i32, i32) {
    %c0_i32 = arith.constant 0 : i32
    return %arg2, %arg1 : i32, i32
  }
  func.func @transform_2(%arg0: i32, %arg1: i32, %arg2: i32) -> (i32, i32) {
    %c0_i32 = arith.constant 0 : i32
    return %arg0, %arg1 : i32, i32
  }
}

</mosaic_0001>

<bundles_post_ra>
// kernel: tpu_custom_call.1
= control target key start
LH: loop header
LB: loop body
LE: loop exit
PB: predicated region body
PF: predicated region fallthrough
CT: control target
= control target key end

     0   :  { %7 = vsyncpa [#allocation4], 0  ;;  %s272_s0 = inlined_call_operand.hbm [shape: bf16[16,32], index: 0, kind: input, shape index: {}]   ;;  %s273_s1 = inlined_call_operand.hbm [shape: bf16[32,128], index: 1, kind: input, shape index: {}]   ;;  %s274_s2 = inlined_call_operand.hbm [shape: f32[16,128], index: 2, kind: output, shape index: {}]  }
   0x1   :  { %8 = vsyncpa [#allocation7], 0 }
   0x2   :  { %9 = vsyncpa [#allocation5], 0  ;;  %s239_s9 = smov [#allocation3]  }
   0x3   :  { %s15_s10 = sshll.u32 %s239_s9, 4  ;;  %s16_s10 = int_to_ptr.vmem [resolvable:$true] %s15_s10 }
   0x4   :  { %s181_s11 = scalar_lea.vmem %s16_s10, 128  ;;  %p186_p1 = scmp.lt.s32.totalorder %s16_s10, %s16_s10 }
   0x5   :  { %p182_p0 = scmp.ne.s32.totalorder %s16_s10, %s181_s11  ;;  %p187_p2 = scmp.lt.s32.totalorder %s181_s11, %s181_s11 }
   0x7   :  { %p188_p3 = por %p187_p2, %p186_p1 }
   0x9   :  { %p189_p4 = pnand %p188_p3, %p182_p0 }
   0xb   :  { %192 = shalt.err (!%p189_p4)
}
   0xc   :  { %s240_s12 = smov 64   ;;  %s241_s13 = smov 4  }
   0xd   :  { %21 = dma.hbm_to_vmem [thread:$0]  %s272_s0, 128, %s16_s10, [#allocation4], %s240_s12, %s240_s12, %s241_s13  }
   0xe   :  { %s242_s16 = smov [#allocation6]  }
   0xf   :  { %s27_s17 = sshll.u32 %s242_s16, 4  ;;  %s28_s17 = int_to_ptr.vmem [resolvable:$true] %s27_s17 }
  0x10   :  { %s201_s18 = scalar_lea.vmem %s28_s17, 256  ;;  %p206_p6 = scmp.lt.s32.totalorder %s28_s17, %s28_s17 }
  0x11   :  { %p202_p5 = scmp.ne.s32.totalorder %s28_s17, %s201_s18  ;;  %p207_p7 = scmp.lt.s32.totalorder %s201_s18, %s201_s18 }
  0x13   :  { %p208_p8 = por %p207_p7, %p206_p6 }
  0x15   :  { %p209_p9 = pnand %p208_p8, %p202_p5 }
  0x17   :  { %212 = shalt.err (!%p209_p9)
}
  0x18   :  { %33 = dma.hbm_to_vmem [thread:$0]  %s273_s1, 256, %s28_s17, [#allocation7], %s240_s12, %s240_s12, %s241_s13  }
  0x19   :  { %233 = dma.done.wait [#allocation4], 128  }
  0x1a   :  { %234 = vsyncadd [#allocation4], 4294967168 }
  0x1b   :  { %235 = dma.done.wait [#allocation7], 256  }
  0x1c   :  { %236 = vsyncadd [#allocation7], 4294967040  ;;  %v243_v0 = vmov 0.0   ;;  %vm244_vm0 = vmmov 0   ;;  %v170_v1 = vld [vmem:[#allocation6 + $0x8] sm:$0xff]   ;;  %v171_v2 = vld [vmem:[#allocation6] sm:$0xff]  }
  0x1d   :  { %153 = vmatprep.subr.bf16.mxu0 %v243_v0  ;;  %157 = vmatprep.mubr.msk.bf16.mxu0 %vm244_vm0, %v243_v0  ;;  %v172_v3 = vld [vmem:[#allocation3] sm:$0xff]   ;;  %vm72_vm1 = vcmask 261120   ;;  %s245_s0 = smov [#allocation8]  }
  0x1e   :  { %154 = vmatpush3.bf16.msra.mxu0 %v170_v1  ;;  %s133_s21 = sshll.u32 %s245_s0, 4  ;;  %s134_s21 = int_to_ptr.vmem [resolvable:$true] %s133_s21 }
  0x1f   :  { %155 = vmatprep.subr.bf16.mxu0 %v243_v0  ;;  %s213_s1 = scalar_lea.vmem %s134_s21, 256  ;;  %p218_p11 = scmp.lt.s32.totalorder %s134_s21, %s134_s21 }
  0x20   :  { %p214_p10 = scmp.ne.s32.totalorder %s134_s21, %s213_s1  ;;  %p219_p12 = scmp.lt.s32.totalorder %s213_s1, %s213_s1 }
  0x22   :  { %156 = vmatpush3.bf16.msra.mxu0 %v171_v2  ;;  %p220_p13 = por %p219_p12, %p218_p11 }
  0x24   :  { %p221_p0 = pnand %p220_p13, %p214_p10 }
  0x25   :  { %158 = vmatmul.mubr.msk.bf16.vlgmr.msra.gmra.mxu0 %vm72_vm1, %v172_v3 }
  0xe5   :  { %v110_v4 = vpop.f32.mrf.mxu0 }
  0xe6   :  { %126 = vst [vmem:[#allocation8] sm:$0xff] %v110_v4 }
  0xe7   :  { %v159_v5 = vpop.f32.mrf.mxu0 }
  0xe9   :  { %v113_v6 = vpop.f32.mrf.mxu0 }
  0xea   :  { %127 = vst [vmem:[#allocation8 + $0x8] sm:$0xff] %v113_v6 }
  0xeb   :  { %v160_v7 = vpop.f32.mrf.mxu0 }
  0xec   :  { %224 = shalt.err (!%p221_p0)
}
  0xed   :  { %s246_s22 = smov 128   ;;  %s247_s23 = smov 8  }
  0xee   :  { %139 = dma.vmem_to_hbm [thread:$0]  %s134_s21, 256, %s274_s2, [#allocation5], %s246_s22, %s246_s22, %s247_s23  }
  0xef   :  { %237 = dma.done.wait [#allocation5], 256  }
  0xf0   :  { %238 = vsyncadd [#allocation5], 4294967040 }
  0xf1   :  { %143 = vsyncpa [#allocation4], 1 }
  0xf2   :  { %144 = vsyncpa [#allocation7], 1 }
  0xf3   :  { %145 = vsyncpa [#allocation5], 1 }

</bundles_post_ra>
